<compile_context>
chip_gen: v6e
topology: v6e:2x2x1
jax: 0.10.0
libtpu: 0.0.40
codegen_flags: <defaults>
</compile_context>

<pallas_src>
import jax
import jax.numpy as jnp
from jax.experimental import pallas as pl
from jax.experimental.pallas import tpu as pltpu


# ---------------------------------------------------------------------------
# 1) Standalone kernel mirroring the module's forward() (task-spec deliverable)
# ---------------------------------------------------------------------------
def _single_variance_kernel(var_ref, out_ref):
    # var_ref: (1,) float32 in SMEM (scalar parameter, no vector-path padding).
    # out_ref: (1, 1) float32 in VMEM.
    v = var_ref[0]                                  # SMEM scalar load (sreg)
    x = jnp.full((1, 1), v, dtype=jnp.float32)      # sreg -> vreg broadcast
    out_ref[...] = jnp.exp(x * 10.0)                # VPU mul + EUP exp, one store


def single_variance_forward(variance_param: jax.Array, *, keep_block: bool = False):
    """Pallas equivalent of SingleVarianceNetwork.forward().

    Args:
      variance_param: (1,) float32 array holding the scalar parameter.
      keep_block: if True, return the raw (1, 1) output block (preferred when a
        downstream kernel consumes it directly — avoids the extra squeeze op).

    Returns:
      (1, 1) float32 block if keep_block else 0-d float32 == exp(variance*10).
    """
    out = pl.pallas_call(
        _single_variance_kernel,
        out_shape=jax.ShapeDtypeStruct((1, 1), jnp.float32),
        in_specs=[pl.BlockSpec(memory_space=pltpu.SMEM)],   # scalar lives in SMEM
        out_specs=pl.BlockSpec(memory_space=pltpu.VMEM),
        cost_estimate=pl.CostEstimate(
            flops=1,
            transcendentals=1,
            # honest estimate: 4 B SMEM input + one padded (8,128) f32 tile out
            bytes_accessed=4 + 8 * 128 * 4,
        ),
    )(variance_param)
    if keep_block:
        return out
    return out[0, 0]   # 0-d scalar, matching torch.exp(0-d tensor)


def inv_s_reference(variance_param: jax.Array) -> jax.Array:
    """Plain-JAX fused form (preferred in production; XLA fuses it for free)."""
    return jnp.exp(variance_param.reshape(()) * 10.0)


# ---------------------------------------------------------------------------
# 2) Recommended structural pattern from the review: fuse exp(v*10) into the
#    consumer kernel's prologue and broadcast inv_s lazily (never [N,1] in HBM).
#    Example consumer: NeuS-style sigmoid(sdf * inv_s) over a lane-dense slab.
# ---------------------------------------------------------------------------
def _fused_consumer_kernel(var_ref, sdf_ref, out_ref):
    # var_ref: (1,) f32 in SMEM (the raw parameter, NOT a pre-materialized inv_s).
    # sdf_ref/out_ref: (tile_rows, 128) f32 in VMEM — lane-dense, unmasked stores.
    inv_s = jnp.exp(var_ref[0] * 10.0)              # one EUP op, hidden under real work
    x = sdf_ref[...] * inv_s                        # in-register broadcast, free
    out_ref[...] = 1.0 / (1.0 + jnp.exp(-x))        # sigmoid via VPU + EUP


def fused_sigmoid_sdf(variance_param: jax.Array, sdf: jax.Array, *, tile_rows: int = 128):
    n, c = sdf.shape
    assert n % tile_rows == 0 and c % 128 == 0, (n, c)
    return pl.pallas_call(
        _fused_consumer_kernel,
        out_shape=jax.ShapeDtypeStruct((n, c), jnp.float32),
        grid_spec=pltpu.PrefetchScalarGridSpec(
            num_scalar_prefetch=0,
            grid=(n // tile_rows,),
            in_specs=[
                pl.BlockSpec(memory_space=pltpu.SMEM),          # variance scalar
                pl.BlockSpec((tile_rows, c), lambda i: (i, 0)),  # sdf tile
            ],
            out_specs=pl.BlockSpec((tile_rows, c), lambda i: (i, 0)),
        ),
        compiler_params=pltpu.CompilerParams(
            dimension_semantics=("parallel",)),     # lets v7x spread tiles over both TCs
    )(variance_param, sdf)


class SingleVarianceNetworkPallas:
    """Thin parameter container mirroring the PyTorch module."""

    def __init__(self, init_val: float):
        # nn.Parameter(torch.tensor(init_val)) -> (1,) f32 so it can ride SMEM.
        self.variance = jnp.full((1,), init_val, dtype=jnp.float32)

    def __call__(self) -> jax.Array:
        return single_variance_forward(self.variance)


if __name__ == "__main__":
    key = jax.random.PRNGKey(0)
    init_val = 0.3   # canonical NeuS init

    # --- module-mirror kernel ---------------------------------------------
    net = SingleVarianceNetworkPallas(init_val)
    result = jax.block_until_ready(net())

    expected = jnp.exp(jnp.float32(init_val) * 10.0)
    assert result.shape == (), result.shape
    assert jnp.allclose(result, expected, rtol=1e-6, atol=1e-6), (result, expected)
    assert jnp.allclose(inv_s_reference(net.variance), expected, rtol=1e-6, atol=1e-6)

    # --- fused-consumer demo (recommended structure) ------------------------
    sdf = jax.random.normal(key, (256, 128), dtype=jnp.float32) * 0.1
    fused = jax.block_until_ready(fused_sigmoid_sdf(net.variance, sdf))
    fused_ref = 1.0 / (1.0 + jnp.exp(-(sdf * expected)))
    assert fused.shape == sdf.shape, fused.shape
    assert jnp.allclose(fused, fused_ref, rtol=1e-5, atol=1e-5), float(
        jnp.max(jnp.abs(fused - fused_ref)))

    print("KERNEL_OK")
</pallas_src>

<mosaic_0001>
module attributes {stable_mosaic.version = 11 : i64} {
  func.func @_single_variance_kernel(%arg0: memref<1xf32, #tpu.memory_space<smem>>, %arg1: memref<1x1xf32, #tpu.memory_space<vmem>>) attributes {dimension_semantics = [], scalar_prefetch = 0 : i64, scratch_operands = 0 : i64, tpu.core_type = #tpu.core_type<tc>} {
    %c0 = arith.constant 0 : index
    %0 = memref.load %arg0[%c0] : memref<1xf32, #tpu.memory_space<smem>>
    %1 = vector.broadcast %0 : f32 to vector<1x1xf32>
    %cst = arith.constant 1.000000e+01 : f32
    %2 = vector.broadcast %cst : f32 to vector<1x1xf32>
    %3 = arith.mulf %1, %2 : vector<1x1xf32>
    %4 = math.exp %3 : vector<1x1xf32>
    %c0_0 = arith.constant 0 : index
    %c0_1 = arith.constant 0 : index
    %5 = vector.load %arg1[%c0_0, %c0_1] : memref<1x1xf32, #tpu.memory_space<vmem>>, vector<1x1xf32>
    tpu.vector_store %arg1[%c0_0, %c0_1], %4 {strides = array<i32>} : memref<1x1xf32, #tpu.memory_space<vmem>>, vector<1x1xf32>,
    return
  }
}

</mosaic_0001>

<bundles_post_ra>
// kernel: tpu_custom_call.1
= control target key start
LH: loop header
LB: loop body
LE: loop exit
PB: predicated region body
PF: predicated region fallthrough
CT: control target
= control target key end

     0   :  { %s73_s0 = inlined_call_operand.<no memory space> [shape: f32[1], index: 0, kind: input, shape index: {}]   ;;  %s74_s1 = inlined_call_operand.hbm [shape: f32[1,1], index: 1, kind: output, shape index: {}]  }
   0x1   :  { %v11_v0 = vstv %s73_s0 }
   0x2   :  { %7 = vsyncpa [#allocation4], 0  ;;  %v12_v1 = vmul.f32 10.0, %v11_v0  ;;  %s56_s8 = smov [#allocation3]   ;;  %vm15_vm0 = vcmask 0  }
   0x3   :  { %s23_s9 = sshll.u32 %s56_s8, 4  ;;  %s24_s9 = int_to_ptr.vmem [resolvable:$true] %s23_s9 }
   0x4   :  { %v13_v2 = vmul.f32 1.442695, %v12_v1  ;;  %s34_s10 = scalar_lea.vmem %s24_s9, 16  ;;  %s38_s11 = scalar_lea.vmem %s24_s9, 32 }
   0x5   :  { %p35_p0 = scmp.ne.s32.totalorder %s24_s9, %s34_s10  ;;  %p39_p1 = scmp.lt.s32.totalorder %s24_s9, %s24_s9 }
   0x6   :  { %32 = vpow2.f32 %v13_v2  ;;  %p40_p2 = scmp.lt.s32.totalorder %s38_s11, %s34_s10 }
   0x8   :  { %p41_p3 = por %p40_p2, %p39_p1 }
   0xa   :  { %p42_p4 = pnand %p41_p3, %p35_p0 }
  0x13   :  { %v33_v3 = vpop.eup %32 }
  0x14   :  { %16 = vst.msk [vmem:[#allocation3] sm:$0x1] %vm15_vm0, %v33_v3 }
  0x15   :  { %45 = shalt.err (!%p42_p4)
}
  0x16   :  { %26 = dma.vmem_to_hbm [thread:$0]  %s24_s9, 16, %s74_s1, [#allocation4]  }
  0x17   :  { %54 = dma.done.wait [#allocation4], 16  }
  0x18   :  { %55 = vsyncadd [#allocation4], 4294967280 }
  0x19   :  { %30 = vsyncpa [#allocation4], 1 }

</bundles_post_ra>
